<compile_context>
chip_gen: v7x
topology: tpu7x:2x2x1
jax: 0.10.0
libtpu: 0.0.40
codegen_flags: <defaults>
</compile_context>

<pallas_src>
import functools

import jax
import jax.numpy as jnp
from jax.experimental import pallas as pl
from jax.experimental.pallas import tpu as pltpu

_LANES = 128
_CHUNK_ROWS = 1024              # rows processed per in-kernel chunk (512 KiB f32)
_TILE_BYTES = 4 * 1024 * 1024   # target HBM bytes DMA'd per grid step


def _round_up(x, m):
    return ((x + m - 1) // m) * m


def _elementwise_loss(x, gan_type, y):
    """Per-element loss in f32.  NOTE: the wgan sign is applied to the final scalar
    outside the kernel, not here."""
    if gan_type == "wgan":
        return x
    yf = float(y)
    if gan_type in ("gan", "ragan"):
        # BCEWithLogitsLoss, numerically stable; specialised on the label constant.
        sp = jnp.log1p(jnp.exp(-jnp.abs(x)))      # log(1 + e^{-|x|})
        if yf == 1.0:
            return jnp.maximum(-x, 0.0) + sp
        if yf == 0.0:
            return jnp.maximum(x, 0.0) + sp
        return jnp.maximum(x, 0.0) - x * jnp.float32(yf) + sp
    if gan_type == "lsgan":
        # MSELoss
        if yf == 0.0:
            return x * x
        d = x - jnp.float32(yf)
        return d * d
    raise NotImplementedError(f"GAN type [{gan_type}] is not found")


def _make_kernel(gan_type, y, block_rows, num_blocks, num_splits, steps,
                 valid_rows_last):
    needs_mask = valid_rows_last < block_rows           # static
    has_phantom = num_splits * steps > num_blocks       # static

    def accumulate_block(x_ref, o_ref, mask_limit):
        # Consume the (block_rows, 128) tile in <=1024-row chunks so live f32
        # temporaries stay small; lane-parallel partial sums into an (8,128) acc.
        acc = jnp.zeros((8, _LANES), jnp.float32)
        start = 0
        while start < block_rows:
            rows_c = min(_CHUNK_ROWS, block_rows - start)
            if mask_limit is not None and start >= mask_limit:
                break                                    # fully-OOB chunk: skip (static)
            xc = x_ref[start:start + rows_c, :].astype(jnp.float32)
            e = _elementwise_loss(xc, gan_type, y)
            if mask_limit is not None and start + rows_c > mask_limit:
                # Mask AFTER the loss compute: garbage rows may be Inf/NaN but are
                # replaced by 0.0 before accumulation.
                r = jax.lax.broadcasted_iota(jnp.int32, e.shape, 0) + start
                e = jnp.where(r < mask_limit, e, 0.0)
            acc = acc + e.reshape(rows_c // 8, 8, _LANES).sum(axis=0)
            start += rows_c
        o_ref[...] += acc                                # full-vreg add, unmasked store

    def kernel(x_ref, o_ref):
        p = pl.program_id(0)        # TensorCore split ("parallel")
        j = pl.program_id(1)        # sequential reduction steps within the split
        g = p * steps + j           # global block index

        @pl.when(j == 0)
        def _init():
            o_ref[...] = jnp.zeros_like(o_ref)

        if needs_mask:
            @pl.when(g < num_blocks - 1)
            def _hot():                      # steady state: completely mask-free
                accumulate_block(x_ref, o_ref, None)

            @pl.when(g == num_blocks - 1)
            def _tail():                     # only the global last block masks OOB rows
                accumulate_block(x_ref, o_ref, valid_rows_last)
        elif has_phantom:
            @pl.when(g < num_blocks)
            def _hot():
                accumulate_block(x_ref, o_ref, None)
        else:
            accumulate_block(x_ref, o_ref, None)

    return kernel


@functools.partial(
    jax.jit,
    static_argnames=("gan_type", "target_is_real", "real_label_val",
                     "fake_label_val", "block_rows_cap"))
def gan_loss(x, *, gan_type, target_is_real, real_label_val=1.0,
             fake_label_val=0.0, block_rows_cap=None):
    """Pallas-TPU equivalent of GANLoss(gan_type, ...)(x, target_is_real)."""
    gan_type = gan_type.lower()
    if gan_type not in ("gan", "ragan", "lsgan", "wgan"):
        raise NotImplementedError(f"GAN type [{gan_type}] is not found")
    y = float(real_label_val if target_is_real else fake_label_val)

    n = x.size
    flat = x.reshape(-1)                 # native dtype; cast to f32 inside the kernel
    rem = n % _LANES
    n_body = n - rem

    # <128-element ragged tail: tiny host-side sum (avoids a full-tensor pad copy).
    tail_sum = jnp.float32(0.0)
    if rem:
        tail = flat[n_body:].astype(jnp.float32)
        tail_sum = jnp.sum(_elementwise_loss(tail, gan_type, y))

    body_sum = jnp.float32(0.0)
    if n_body:
        body = flat if rem == 0 else flat[:n_body]
        rows = n_body // _LANES
        x2 = body.reshape(rows, _LANES)  # lane-dense slab

        itemsize = jnp.dtype(x.dtype).itemsize
        packing = max(1, 4 // itemsize)            # elems per 32-bit sublane word
        row_align = 8 * packing                    # 8 (f32), 16 (bf16), 32 (int8)
        max_block_rows = max(row_align, _TILE_BYTES // (_LANES * itemsize))
        if block_rows_cap is not None:
            max_block_rows = max(row_align, min(max_block_rows, block_rows_cap))

        if rows <= max_block_rows:
            block_rows = _round_up(rows, row_align)
        else:
            nb = pl.cdiv(rows, max_block_rows)
            block_rows = _round_up(pl.cdiv(rows, nb), row_align)   # balanced blocks
        num_blocks = pl.cdiv(rows, block_rows)
        num_splits = 2 if num_blocks > 1 else 1    # v7x: use both TensorCores
        steps = pl.cdiv(num_blocks, num_splits)
        has_phantom = num_splits * steps > num_blocks
        valid_rows_last = rows - (num_blocks - 1) * block_rows

        kernel = _make_kernel(gan_type, y, block_rows, num_blocks, num_splits,
                              steps, valid_rows_last)

        def x_index_map(p, j):
            g = p * steps + j
            if has_phantom:
                # Phantom last step of the second split re-points at the previous
                # block: same index twice in a row => Pallas skips the DMA; the
                # kernel's pl.when guard skips the accumulation.
                g = jnp.minimum(g, num_blocks - 1)
            return (g, 0)

        partials = pl.pallas_call(
            kernel,
            out_shape=jax.ShapeDtypeStruct((8 * num_splits, _LANES), jnp.float32),
            grid_spec=pltpu.PrefetchScalarGridSpec(
                num_scalar_prefetch=0,
                grid=(num_splits, steps),
                in_specs=[pl.BlockSpec((block_rows, _LANES), x_index_map)],
                out_specs=pl.BlockSpec((8, _LANES), lambda p, j: (p, 0)),
            ),
            compiler_params=pltpu.CompilerParams(
                dimension_semantics=("parallel", "arbitrary"),
                vmem_limit_bytes=32 * 1024 * 1024),
        )(x2)
        body_sum = jnp.sum(partials)

    mean = (body_sum + tail_sum) / jnp.float32(n)
    if gan_type == "wgan":
        # wgan sign hoisted out of the kernel: applied once to the final scalar.
        mean = -mean if target_is_real else mean
    return mean


def _ref_gan_loss(x, gan_type, target_is_real, real_label_val=1.0, fake_label_val=0.0):
    xf = x.astype(jnp.float32)
    g = gan_type.lower()
    if g == "wgan":
        return -jnp.mean(xf) if target_is_real else jnp.mean(xf)
    y = jnp.float32(real_label_val if target_is_real else fake_label_val)
    if g in ("gan", "ragan"):
        return jnp.mean(jnp.maximum(xf, 0.0) - xf * y + jnp.log1p(jnp.exp(-jnp.abs(xf))))
    if g == "lsgan":
        return jnp.mean((xf - y) ** 2)
    raise NotImplementedError(g)


if __name__ == "__main__":
    key = jax.random.PRNGKey(0)
    # Discriminator logits, NCHW-like shape (batch=2, channels=4, 16x16 spatial).
    x = jax.random.normal(key, (2, 4, 16, 16), dtype=jnp.float32) * 2.0

    failures = []

    def check(xx, gan_type, target_is_real, rlv=1.0, flv=0.0, cap=None):
        got = jax.block_until_ready(
            gan_loss(xx, gan_type=gan_type, target_is_real=target_is_real,
                     real_label_val=rlv, fake_label_val=flv, block_rows_cap=cap))
        want = _ref_gan_loss(xx, gan_type, target_is_real, rlv, flv)
        if not jnp.allclose(got, want, rtol=1e-5, atol=1e-5):
            failures.append((tuple(xx.shape), str(xx.dtype), gan_type,
                             target_is_real, cap, float(got), float(want)))

    # Primary shape: every loss type / target (single block, mask-free path).
    for gan_type in ("gan", "ragan", "lsgan", "wgan"):
        for target_is_real in (True, False):
            check(x, gan_type, target_is_real)

    # Non-default labels exercise the generic (non-specialised) elementwise paths.
    check(x, "gan", True, rlv=0.9)
    check(x, "lsgan", False, flv=0.1)

    # Ragged element count: aligned-prefix kernel + tiny host-side tail sum.
    x_ragged = jax.random.normal(jax.random.PRNGKey(1), (2, 3, 11, 13), jnp.float32)
    check(x_ragged, "gan", True)
    check(x_ragged, "lsgan", False)

    # Larger input: single partially-valid block, multiple in-kernel chunks.
    x_big = jax.random.normal(jax.random.PRNGKey(2), (1, 3, 192, 232), jnp.float32)
    check(x_big, "gan", True)
    check(x_big, "wgan", False)

    # Forced small tiles: multi-block + 2-way split; cap=256 -> 5 blocks (odd) so the
    # phantom-step guard and clamped index_map are exercised; cap=522 -> even split.
    check(x_big, "gan", True, cap=256)
    check(x_big, "wgan", True, cap=256)
    check(x_big, "lsgan", False, cap=522)

    # Native bf16 streaming (cast to f32 inside the kernel).
    check(x.astype(jnp.bfloat16), "lsgan", True)
    check(x.astype(jnp.bfloat16), "gan", False)

    if failures:
        for f in failures:
            print("MISMATCH", f)
    else:
        print("KERNEL_OK")
</pallas_src>

<mosaic_0001>
module attributes {stable_mosaic.version = 11 : i64} {
  func.func @kernel(%arg0: i32, %arg1: i32, %arg2: memref<16x128xf32, #tpu.memory_space<vmem>>, %arg3: memref<8x128xf32, #tpu.memory_space<vmem>>) attributes {dimension_semantics = [#tpu.dimension_semantics<parallel>, #tpu.dimension_semantics<arbitrary>], iteration_bounds = array<i64: 1, 1>, scalar_prefetch = 0 : i64, scratch_operands = 0 : i64, tpu.core_type = #tpu.core_type<tc>, window_params = [{transform_indices = @transform_0, window_bounds = array<i64: 16, 128>}, {transform_indices = @transform_1, window_bounds = array<i64: 8, 128>}]} {
    %c0_i32 = arith.constant 0 : i32
    %0 = arith.cmpi eq, %arg1, %c0_i32 : i32
    %1 = arith.extui %0 : i1 to i32
    %c0_i32_0 = arith.constant 0 : i32
    %2 = arith.cmpi ne, %1, %c0_i32_0 : i32
    scf.if %2 {
      %cst_10 = arith.constant 0.000000e+00 : f32
      %21 = vector.broadcast %cst_10 : f32 to vector<8x128xf32>
      %c0_11 = arith.constant 0 : index
      %c0_12 = arith.constant 0 : index
      %22 = vector.load %arg3[%c0_11, %c0_12] : memref<8x128xf32, #tpu.memory_space<vmem>>, vector<8x128xf32>
      tpu.vector_store %arg3[%c0_11, %c0_12], %21 {strides = array<i32>} : memref<8x128xf32, #tpu.memory_space<vmem>>, vector<8x128xf32>,
    } else {
    }
    %cst = arith.constant 0.000000e+00 : f32
    %3 = vector.broadcast %cst : f32 to vector<8x128xf32>
    %c0 = arith.constant 0 : index
    %c0_1 = arith.constant 0 : index
    %4 = vector.load %arg2[%c0, %c0_1] : memref<16x128xf32, #tpu.memory_space<vmem>>, vector<16x128xf32>
    %5 = math.absf %4 : vector<16x128xf32>
    %cst_2 = arith.constant 0.000000e+00 : f32
    %6 = vector.broadcast %cst_2 : f32 to vector<16x128xf32>
    %7 = arith.subf %6, %5 : vector<16x128xf32>
    %8 = math.exp %7 : vector<16x128xf32>
    %9 = math.log1p %8 : vector<16x128xf32>
    %cst_3 = arith.constant 0.000000e+00 : f32
    %10 = vector.broadcast %cst_3 : f32 to vector<16x128xf32>
    %11 = arith.subf %10, %4 : vector<16x128xf32>
    %cst_4 = arith.constant 0.000000e+00 : f32
    %12 = vector.broadcast %cst_4 : f32 to vector<16x128xf32>
    %13 = arith.maximumf %11, %12 : vector<16x128xf32>
    %14 = arith.addf %13, %9 : vector<16x128xf32>
    %15 = vector.shape_cast %14 : vector<16x128xf32> to vector<2x8x128xf32>
    %cst_5 = arith.constant dense<0.000000e+00> : vector<8x128xf32>
    %16 = vector.multi_reduction <add>, %15, %cst_5 [0] : vector<2x8x128xf32> to vector<8x128xf32>
    %17 = arith.addf %3, %16 : vector<8x128xf32>
    %c0_6 = arith.constant 0 : index
    %c0_7 = arith.constant 0 : index
    %18 = vector.load %arg3[%c0_6, %c0_7] : memref<8x128xf32, #tpu.memory_space<vmem>>, vector<8x128xf32>
    %19 = arith.addf %18, %17 : vector<8x128xf32>
    %c0_8 = arith.constant 0 : index
    %c0_9 = arith.constant 0 : index
    %20 = vector.load %arg3[%c0_8, %c0_9] : memref<8x128xf32, #tpu.memory_space<vmem>>, vector<8x128xf32>
    tpu.vector_store %arg3[%c0_8, %c0_9], %19 {strides = array<i32>} : memref<8x128xf32, #tpu.memory_space<vmem>>, vector<8x128xf32>,
    return
  }
  func.func @transform_0(%arg0: i32, %arg1: i32) -> (i32, i32) {
    %c1_i32 = arith.constant 1 : i32
    %0 = arith.muli %arg0, %c1_i32 : i32
    %1 = arith.addi %0, %arg1 : i32
    %c0_i32 = arith.constant 0 : i32
    %c0_i32_0 = arith.constant 0 : i32
    return %1, %c0_i32 : i32, i32
  }
  func.func @transform_1(%arg0: i32, %arg1: i32) -> (i32, i32) {
    %c0_i32 = arith.constant 0 : i32
    %c0_i32_0 = arith.constant 0 : i32
    return %arg0, %c0_i32 : i32, i32
  }
}

</mosaic_0001>

<bundles_post_ra>
// kernel: gan_loss.1
= control target key start
LH: loop header
LB: loop body
LE: loop exit
PB: predicated region body
PF: predicated region fallthrough
CT: control target
= control target key end

     0   :  { %s112_s0 = inlined_call_operand.vmem [shape: f32[16,128], index: 0, kind: input, shape index: {}]   ;;  %s113_s1 = inlined_call_operand.vmem [shape: f32[8,128], index: 1, kind: output, shape index: {}]  }
   0x1   :  { %v35_v0 = vld [vmem:[%s112_s0] sm:$0xff]  ;;  %v36_v1 = vld [vmem:[%s112_s0 + $0x8] sm:$0xff] }
   0x2   :  { %v37_v2 = vand.u32 2147483647, %v35_v0  ;;  %v38_v3 = vand.u32 2147483647, %v36_v1  ;;  %v63_v17 = vsub.f32 0.0, %v35_v0  ;;  %v64_v19 = vsub.f32 0.0, %v36_v1 }
   0x4   :  { %v39_v4 = vsub.f32 0.0, %v37_v2  ;;  %v40_v5 = vsub.f32 0.0, %v38_v3  ;;  %v65_v23 = vmax.f32 %v63_v17, 0.0  ;;  %v66_v26 = vmax.f32 %v64_v19, 0.0 }
   0x6   :  { %v41_v6 = vmul.f32 1.442695, %v39_v4  ;;  %v43_v7 = vmul.f32 1.442695, %v40_v5 }
   0x8   :  { %85 = vpow2.f32 %v41_v6 }
   0x9   :  { %87 = vpow2.f32 %v43_v7 }
  0x12   :  { %v86_v8 = vpop.eup %85 }
  0x13   :  { %v88_v9 = vpop.eup %87  ;;  %v45_v10 = vadd.f32 1.0, %v86_v8  ;;  %v48_v12 = vmul.f32 -0.5, %v86_v8  ;;  %v51_v15 = vand.u32 2147483647, %v86_v8 }
  0x14   :  { %v54_v11 = vadd.f32 1.0, %v88_v9  ;;  %v57_v13 = vmul.f32 -0.5, %v88_v9  ;;  %v60_v18 = vand.u32 2147483647, %v88_v9 }
  0x15   :  { %89 = vlog2.f32 %v45_v10  ;;  %v49_v14 = vadd.f32 1.0, %v48_v12  ;;  %vm52_vm0 = vcmp.lt.f32.partialorder %v51_v15, 0.0004427343 }
  0x16   :  { %91 = vlog2.f32 %v54_v11  ;;  %v58_v16 = vadd.f32 1.0, %v57_v13  ;;  %vm61_vm1 = vcmp.lt.f32.partialorder %v60_v18, 0.0004427343 }
  0x17   :  { %v50_v20 = vmul.f32 %v86_v8, %v49_v14 }
  0x18   :  { %v59_v22 = vmul.f32 %v88_v9, %v58_v16 }
  0x1f   :  { %v90_v21 = vpop.eup %89 }
  0x20   :  { %v92_v24 = vpop.eup %91  ;;  %v47_v25 = vmul.f32 0.6931472, %v90_v21 }
  0x21   :  { %v56_v27 = vmul.f32 0.6931472, %v92_v24 }
  0x22   :  { %v53_v28 = vsel %vm52_vm0, %v50_v20, %v47_v25 }
  0x23   :  { %v62_v29 = vsel %vm61_vm1, %v59_v22, %v56_v27  ;;  %v67_v30 = vadd.f32 %v65_v23, %v53_v28 }
  0x24   :  { %v68_v31 = vadd.f32 %v66_v26, %v62_v29 }
  0x26   :  { %v69_v32 = vadd.f32 %v68_v31, %v67_v30 }
  0x28   :  { %73 = vst [vmem:[%s113_s1] sm:$0xff] %v69_v32 }

</bundles_post_ra>
